<compile_context>
chip_gen: v7x
topology: tpu7x:2x2x1
jax: 0.10.0
libtpu: 0.0.40
codegen_flags: <defaults>
</compile_context>

<pallas_src>
import jax
import jax.numpy as jnp
from jax.experimental import pallas as pl
from jax.experimental.pallas import tpu as pltpu


def _make_kernel(nb, H, Hq1, Hq2, L1, L2, ncls):
    """Fused forward kernel for a block of `nb` images.

    x_ref   : (nb*H, W)        bf16 input rows (image b occupies rows [b*H, (b+1)*H))
    g1_ref  : (2, W, 2*L1)     bf16 conv1 band matrices (kh=0/1), even|odd pool cols
    s1/t1   : (1, L1)          f32 BN1 scale/shift tiled to the (w, c) lane layout
    g2_ref  : (2, L1, 2*L2)    bf16 conv2 band matrices
    s2/t2   : (1, L2)          f32 BN2 scale/shift tiled
    wfc_ref : (Hq2, L2, ncls)  bf16 folded fc1@fc2, reordered to (h, w*C2+c, k)
    bf_ref  : (1, ncls)        f32 folded fc bias
    o_ref   : (nb, 1, ncls)    f32 logits
    """

    def kernel(x_ref, g1_ref, s1_ref, t1_ref, g2_ref, s2_ref, t2_ref,
               wfc_ref, bf_ref, o_ref):
        f32 = jnp.float32
        bf16 = jnp.bfloat16

        # ---- conv1: 2 banded MXU matmuls (W-pad + W-pool selection folded into g1) ----
        x = x_ref[...]                                             # (nb*H, W) bf16
        a0 = jnp.dot(x, g1_ref[0], preferred_element_type=f32)     # kh = 0 term
        a1 = jnp.dot(x, g1_ref[1], preferred_element_type=f32)     # kh = 1 term
        a0 = a0.reshape(nb, H, 2 * L1)
        a1 = a1.reshape(nb, H, 2 * L1)
        # conv output row h (0..H-1) = a0[h-1] + a1[h]  (row -1 is the zero pad row)
        y1 = a1 + jnp.concatenate(
            [jnp.zeros((nb, 1, 2 * L1), f32), a0[:, :H - 1, :]], axis=1)
        # BN1 + ReLU on the even/odd pooling columns, then max over the W pair
        s1 = s1_ref[...]
        t1 = t1_ref[...]
        y1e = jnp.maximum(y1[:, :, :L1] * s1 + t1, 0.0)
        y1o = jnp.maximum(y1[:, :, L1:] * s1 + t1, 0.0)
        y1m = jnp.maximum(y1e, y1o)                                # (nb, H, L1)
        # max over H pairs -> pooled conv1 block (nb, Hq1, L1)
        p1 = jnp.concatenate(
            [jnp.maximum(y1m[:, 2 * i:2 * i + 1, :],
                         y1m[:, 2 * i + 1:2 * i + 2, :])
             for i in range(Hq1)], axis=1)
        p1_2d = p1.reshape(nb * Hq1, L1).astype(bf16)

        # ---- conv2: same structure -----------------------------------------------------
        b0 = jnp.dot(p1_2d, g2_ref[0], preferred_element_type=f32)
        b1 = jnp.dot(p1_2d, g2_ref[1], preferred_element_type=f32)
        b0 = b0.reshape(nb, Hq1, 2 * L2)
        b1 = b1.reshape(nb, Hq1, 2 * L2)
        y2 = b1 + jnp.concatenate(
            [jnp.zeros((nb, 1, 2 * L2), f32), b0[:, :Hq1 - 1, :]], axis=1)
        s2 = s2_ref[...]
        t2 = t2_ref[...]
        y2e = jnp.maximum(y2[:, :, :L2] * s2 + t2, 0.0)
        y2o = jnp.maximum(y2[:, :, L2:] * s2 + t2, 0.0)
        y2m = jnp.maximum(y2e, y2o)                                # (nb, Hq1, L2)

        # ---- H-pool of conv2 fused with the folded fc1@fc2 contraction ----------------
        acc = jnp.zeros((nb, ncls), f32)
        for i in range(Hq2):
            row = jnp.maximum(y2m[:, 2 * i, :], y2m[:, 2 * i + 1, :])   # (nb, L2)
            acc = acc + jnp.dot(row.astype(bf16), wfc_ref[i],
                                preferred_element_type=f32)
        o_ref[...] = (acc + bf_ref[...]).reshape(nb, 1, ncls)

    return kernel


def _band_matrix(w_kh, win, wout):
    """(win*cin, wout*cout) matrix G with
       (x_row @ G)[w*cout+co] = sum_{kw,ci} x_row[(w+kw-1)*cin+ci] * w_kh[kw,ci,co]
       (i.e. a k=2, stride-1, pad-1 conv along W; out-of-range pad taps dropped)."""
    kws, cin, cout = w_kh.shape
    wx = jnp.arange(win).reshape(win, 1)
    wo = jnp.arange(wout).reshape(1, wout)
    g = jnp.zeros((win, cin, wout, cout), jnp.float32)
    for kw in range(kws):
        m = (wx == wo + (kw - 1)).astype(jnp.float32)              # padding = 1
        g = g + m[:, None, :, None] * w_kh[kw][None, :, None, :]
    return g.reshape(win * cin, wout * cout)


def _pool_w_select(wconv, c, wq, parity):
    """0/1 matrix (wconv*c, wq*c) selecting conv column 2*wq+parity of every channel."""
    w = jnp.arange(wconv).reshape(wconv, 1)
    q = jnp.arange(wq).reshape(1, wq)
    m = (w == 2 * q + parity).astype(jnp.float32)
    eye = jnp.eye(c, dtype=jnp.float32)
    return (m[:, None, :, None] * eye[None, :, None, :]).reshape(wconv * c, wq * c)


def cnn_forward(x_nchw, p, *, max_block=64):
    """Forward pass matching CNN.forward (BatchNorm in eval mode)."""
    n = x_nchw.shape[0]
    x = x_nchw[:, 0, :, :].astype(jnp.float32)                     # (N, H, W), Cin = 1
    H, W = x.shape[1], x.shape[2]
    C1 = p["w1"].shape[-1]
    C2 = p["w2"].shape[-1]
    ncls = p["fc2_w"].shape[1]
    Ho1, Wo1 = H + 1, W + 1
    Hq1, Wq1 = Ho1 // 2, Wo1 // 2
    Ho2, Wo2 = Hq1 + 1, Wq1 + 1
    Hq2, Wq2 = Ho2 // 2, Wo2 // 2
    L1 = Wq1 * C1                                                  # 128
    L2 = Wq2 * C2                                                  # 128

    # ---- trace-time constant folding (all outside the kernel) ----
    se1, so1 = _pool_w_select(Wo1, C1, Wq1, 0), _pool_w_select(Wo1, C1, Wq1, 1)
    g1 = []
    for kh in range(2):
        gk = _band_matrix(p["w1"][kh], W, Wo1)                     # (W, Wo1*C1)
        g1.append(jnp.concatenate([gk @ se1, gk @ so1], axis=1))   # (W, 2*L1)
    g1 = jnp.stack(g1, axis=0).astype(jnp.bfloat16)                # (2, W, 2*L1)

    se2, so2 = _pool_w_select(Wo2, C2, Wq2, 0), _pool_w_select(Wo2, C2, Wq2, 1)
    g2 = []
    for kh in range(2):
        gk = _band_matrix(p["w2"][kh], Wq1, Wo2)                   # (L1, Wo2*C2)
        g2.append(jnp.concatenate([gk @ se2, gk @ so2], axis=1))   # (L1, 2*L2)
    g2 = jnp.stack(g2, axis=0).astype(jnp.bfloat16)                # (2, L1, 2*L2)

    # BN scale/shift tiled to the (w, c) lane layout; conv bias folded into the shift
    s1p = jnp.tile(p["bn1_scale"], Wq1).reshape(1, L1)
    t1p = jnp.tile(p["bn1_shift"] + p["b1"] * p["bn1_scale"], Wq1).reshape(1, L1)
    s2p = jnp.tile(p["bn2_scale"], Wq2).reshape(1, L2)
    t2p = jnp.tile(p["bn2_shift"] + p["b2"] * p["bn2_scale"], Wq2).reshape(1, L2)

    # fold fc1 and fc2 (no activation between them) and reorder from NCHW-flatten
    # (c*Hq2*Wq2 + h*Wq2 + w) to the kernel layout (h, w*C2 + c)
    wf = p["fc1_w"] @ p["fc2_w"]                                   # (C2*Hq2*Wq2, ncls)
    wfc = (wf.reshape(C2, Hq2, Wq2, ncls).transpose(1, 2, 0, 3)
             .reshape(Hq2, L2, ncls).astype(jnp.bfloat16))
    bf = (p["fc1_b"] @ p["fc2_w"] + p["fc2_b"]).reshape(1, ncls)

    # ---- batch blocking: >=2 'parallel' grid steps (v7x megacore), <=max_block imgs each
    nb = max(1, min(max_block, -(-n // 2)))
    grid_n = -(-n // nb)
    npad = grid_n * nb
    if npad != n:
        x = jnp.concatenate([x, jnp.zeros((npad - n, H, W), x.dtype)], axis=0)
    x2d = x.reshape(npad * H, W).astype(jnp.bfloat16)

    kernel = _make_kernel(nb, H, Hq1, Hq2, L1, L2, ncls)
    out = pl.pallas_call(
        kernel,
        out_shape=jax.ShapeDtypeStruct((npad, 1, ncls), jnp.float32),
        grid=(grid_n,),
        in_specs=[
            pl.BlockSpec((nb * H, W), lambda i: (i, 0)),
            pl.BlockSpec((2, W, 2 * L1), lambda i: (0, 0, 0)),
            pl.BlockSpec((1, L1), lambda i: (0, 0)),
            pl.BlockSpec((1, L1), lambda i: (0, 0)),
            pl.BlockSpec((2, L1, 2 * L2), lambda i: (0, 0, 0)),
            pl.BlockSpec((1, L2), lambda i: (0, 0)),
            pl.BlockSpec((1, L2), lambda i: (0, 0)),
            pl.BlockSpec((Hq2, L2, ncls), lambda i: (0, 0, 0)),
            pl.BlockSpec((1, ncls), lambda i: (0, 0)),
        ],
        out_specs=pl.BlockSpec((nb, 1, ncls), lambda i: (i, 0, 0)),
        compiler_params=pltpu.CompilerParams(
            dimension_semantics=("parallel",)),
    )(x2d, g1, s1p, t1p, g2, s2p, t2p, wfc, bf)
    return out.reshape(npad, ncls)[:n]


def cnn_reference(x_nchw, p):
    """Pure-JAX reference (same eval-mode BN semantics) for correctness checking."""
    x = jnp.transpose(x_nchw, (0, 2, 3, 1)).astype(jnp.float32)

    def block(h, w, b, scale, shift):
        y = jax.lax.conv_general_dilated(
            h, w, window_strides=(1, 1), padding=((1, 1), (1, 1)),
            dimension_numbers=("NHWC", "HWIO", "NHWC"))
        y = jnp.maximum((y + b) * scale + shift, 0.0)
        return jax.lax.reduce_window(y, -jnp.inf, jax.lax.max,
                                     (1, 2, 2, 1), (1, 2, 2, 1), "VALID")

    h1 = block(x, p["w1"], p["b1"], p["bn1_scale"], p["bn1_shift"])
    h2 = block(h1, p["w2"], p["b2"], p["bn2_scale"], p["bn2_shift"])
    n = x.shape[0]
    flat = jnp.transpose(h2, (0, 3, 1, 2)).reshape(n, -1)          # NCHW flatten
    h = flat @ p["fc1_w"] + p["fc1_b"]
    return h @ p["fc2_w"] + p["fc2_b"]


def init_params(key, *, w_global=16, c_classes=3):
    """Deterministic synthetic parameters (shapes per the module's __init__)."""
    ks = jax.random.split(key, 16)
    eps = 1e-5

    def u(k, shape, s=0.1):
        return jax.random.uniform(k, shape, jnp.float32, -1.0, 1.0) * s

    p = {}
    # conv1: 1 -> 16, kernel 2x2   (weights stored as (kh, kw, cin, cout))
    p["w1"] = u(ks[0], (2, 2, 1, 16), 0.5)
    p["b1"] = u(ks[1], (16,), 0.1)
    g1, beta1 = 1.0 + u(ks[2], (16,), 0.1), u(ks[3], (16,), 0.1)
    m1, v1 = u(ks[4], (16,), 0.1), 1.0 + jnp.abs(u(ks[5], (16,), 0.2))
    p["bn1_scale"] = g1 / jnp.sqrt(v1 + eps)
    p["bn1_shift"] = beta1 - m1 * p["bn1_scale"]
    # conv2: 16 -> 32, kernel 2x2
    p["w2"] = u(ks[6], (2, 2, 16, 32), 0.2)
    p["b2"] = u(ks[7], (32,), 0.1)
    g2, beta2 = 1.0 + u(ks[8], (32,), 0.1), u(ks[9], (32,), 0.1)
    m2, v2 = u(ks[10], (32,), 0.1), 1.0 + jnp.abs(u(ks[11], (32,), 0.2))
    p["bn2_scale"] = g2 / jnp.sqrt(v2 + eps)
    p["bn2_shift"] = beta2 - m2 * p["bn2_scale"]
    # fc1: 32*W -> 8*W ; fc2: 8*W -> C   (stored as (in, out))
    d_in, d_hid = 32 * w_global, 8 * w_global
    p["fc1_w"] = u(ks[12], (d_in, d_hid), 0.05)
    p["fc1_b"] = u(ks[13], (d_hid,), 0.1)
    p["fc2_w"] = u(ks[14], (d_hid, c_classes), 0.1)
    p["fc2_b"] = u(ks[15], (c_classes,), 0.1)
    return p


if __name__ == "__main__":
    key = jax.random.PRNGKey(0)
    kx, kp = jax.random.split(key)
    # batch=2, in_channels=1, 16x16 input  =>  global W = 16, C = 3 classes
    x = jax.random.normal(kx, (2, 1, 16, 16), jnp.float32)
    params = init_params(kp, w_global=16, c_classes=3)

    out = jax.jit(cnn_forward)(x, params)
    out = jax.block_until_ready(out)

    assert out.shape == (2, 3), out.shape
    assert bool(jnp.all(jnp.isfinite(out)))

    ref = jax.block_until_ready(jax.jit(cnn_reference)(x, params))
    err = float(jnp.max(jnp.abs(out - ref)))
    # bf16 matmul operands (f32 accumulate) -> keep a loose-but-meaningful tolerance
    assert err < 2e-2, f"kernel/reference mismatch: max abs err = {err}"
    print("KERNEL_OK")
</pallas_src>

<mosaic_0001>
module attributes {stable_mosaic.version = 11 : i64} {
  func.func @kernel(%arg0: i32, %arg1: memref<16x16xbf16, #tpu.memory_space<vmem>>, %arg2: memref<2x16x256xbf16, #tpu.memory_space<vmem>>, %arg3: memref<1x128xf32, #tpu.memory_space<vmem>>, %arg4: memref<1x128xf32, #tpu.memory_space<vmem>>, %arg5: memref<2x128x256xbf16, #tpu.memory_space<vmem>>, %arg6: memref<1x128xf32, #tpu.memory_space<vmem>>, %arg7: memref<1x128xf32, #tpu.memory_space<vmem>>, %arg8: memref<4x128x3xbf16, #tpu.memory_space<vmem>>, %arg9: memref<1x3xf32, #tpu.memory_space<vmem>>, %arg10: memref<1x1x3xf32, #tpu.memory_space<vmem>>) attributes {dimension_semantics = [#tpu.dimension_semantics<parallel>], iteration_bounds = array<i64: 2>, scalar_prefetch = 0 : i64, scratch_operands = 0 : i64, tpu.core_type = #tpu.core_type<tc>, window_params = [{transform_indices = @transform_0, window_bounds = array<i64: 16, 16>}, {pipeline_mode = #tpu.pipeline_mode<synchronous>, transform_indices = @transform_1, window_bounds = array<i64: 2, 16, 256>}, {pipeline_mode = #tpu.pipeline_mode<synchronous>, transform_indices = @transform_2, window_bounds = array<i64: 1, 128>}, {pipeline_mode = #tpu.pipeline_mode<synchronous>, transform_indices = @transform_3, window_bounds = array<i64: 1, 128>}, {pipeline_mode = #tpu.pipeline_mode<synchronous>, transform_indices = @transform_4, window_bounds = array<i64: 2, 128, 256>}, {pipeline_mode = #tpu.pipeline_mode<synchronous>, transform_indices = @transform_5, window_bounds = array<i64: 1, 128>}, {pipeline_mode = #tpu.pipeline_mode<synchronous>, transform_indices = @transform_6, window_bounds = array<i64: 1, 128>}, {pipeline_mode = #tpu.pipeline_mode<synchronous>, transform_indices = @transform_7, window_bounds = array<i64: 4, 128, 3>}, {pipeline_mode = #tpu.pipeline_mode<synchronous>, transform_indices = @transform_8, window_bounds = array<i64: 1, 3>}, {transform_indices = @transform_9, window_bounds = array<i64: 1, 1, 3>}]} {
    %c0 = arith.constant 0 : index
    %c0_0 = arith.constant 0 : index
    %0 = vector.load %arg1[%c0, %c0_0] : memref<16x16xbf16, #tpu.memory_space<vmem>>, vector<16x16xbf16>
    %c0_1 = arith.constant 0 : index
    %c0_2 = arith.constant 0 : index
    %c0_3 = arith.constant 0 : index
    %1 = vector.load %arg2[%c0_1, %c0_2, %c0_3] : memref<2x16x256xbf16, #tpu.memory_space<vmem>>, vector<1x16x256xbf16>
    %2 = vector.shape_cast %1 : vector<1x16x256xbf16> to vector<16x256xbf16>
    %cst = arith.constant dense<0.000000e+00> : vector<16x256xf32>
    %3 = tpu.matmul %0, %2, %cst {dimension_numbers = #tpu.dot_dimension_numbers<[1], [0], [0], [1], [0, 0, 1, 1], [], []>} : vector<16x16xbf16>, vector<16x256xbf16>, vector<16x256xf32> -> vector<16x256xf32>
    %c1 = arith.constant 1 : index
    %c0_4 = arith.constant 0 : index
    %c0_5 = arith.constant 0 : index
    %4 = vector.load %arg2[%c1, %c0_4, %c0_5] : memref<2x16x256xbf16, #tpu.memory_space<vmem>>, vector<1x16x256xbf16>
    %5 = vector.shape_cast %4 : vector<1x16x256xbf16> to vector<16x256xbf16>
    %cst_6 = arith.constant dense<0.000000e+00> : vector<16x256xf32>
    %6 = tpu.matmul %0, %5, %cst_6 {dimension_numbers = #tpu.dot_dimension_numbers<[1], [0], [0], [1], [0, 0, 1, 1], [], []>} : vector<16x16xbf16>, vector<16x256xbf16>, vector<16x256xf32> -> vector<16x256xf32>
    %7 = vector.shape_cast %3 : vector<16x256xf32> to vector<1x16x256xf32>
    %8 = vector.shape_cast %6 : vector<16x256xf32> to vector<1x16x256xf32>
    %cst_7 = arith.constant 0.000000e+00 : f32
    %9 = vector.broadcast %cst_7 : f32 to vector<1x1x256xf32>
    %10 = vector.extract_strided_slice %7 {offsets = [0, 0, 0], sizes = [1, 15, 256], strides = [1, 1, 1]} : vector<1x16x256xf32> to vector<1x15x256xf32>
    %11 = tpu.concatenate %9, %10 in 1 : vector<1x1x256xf32>, vector<1x15x256xf32> -> vector<1x16x256xf32>
    %12 = arith.addf %8, %11 : vector<1x16x256xf32>
    %c0_8 = arith.constant 0 : index
    %c0_9 = arith.constant 0 : index
    %13 = vector.load %arg3[%c0_8, %c0_9] : memref<1x128xf32, #tpu.memory_space<vmem>>, vector<1x128xf32>
    %c0_10 = arith.constant 0 : index
    %c0_11 = arith.constant 0 : index
    %14 = vector.load %arg4[%c0_10, %c0_11] : memref<1x128xf32, #tpu.memory_space<vmem>>, vector<1x128xf32>
    %15 = vector.extract_strided_slice %12 {offsets = [0, 0, 0], sizes = [1, 16, 128], strides = [1, 1, 1]} : vector<1x16x256xf32> to vector<1x16x128xf32>
    %16 = vector.shape_cast %13 : vector<1x128xf32> to vector<1x1x128xf32>
    %17 = vector.broadcast %16 : vector<1x1x128xf32> to vector<1x16x128xf32>
    %18 = arith.mulf %15, %17 : vector<1x16x128xf32>
    %19 = vector.shape_cast %14 : vector<1x128xf32> to vector<1x1x128xf32>
    %20 = vector.broadcast %19 : vector<1x1x128xf32> to vector<1x16x128xf32>
    %21 = arith.addf %18, %20 : vector<1x16x128xf32>
    %cst_12 = arith.constant 0.000000e+00 : f32
    %22 = vector.broadcast %cst_12 : f32 to vector<1x16x128xf32>
    %23 = arith.maximumf %21, %22 : vector<1x16x128xf32>
    %24 = vector.extract_strided_slice %12 {offsets = [0, 0, 128], sizes = [1, 16, 128], strides = [1, 1, 1]} : vector<1x16x256xf32> to vector<1x16x128xf32>
    %25 = vector.shape_cast %13 : vector<1x128xf32> to vector<1x1x128xf32>
    %26 = vector.broadcast %25 : vector<1x1x128xf32> to vector<1x16x128xf32>
    %27 = arith.mulf %24, %26 : vector<1x16x128xf32>
    %28 = vector.shape_cast %14 : vector<1x128xf32> to vector<1x1x128xf32>
    %29 = vector.broadcast %28 : vector<1x1x128xf32> to vector<1x16x128xf32>
    %30 = arith.addf %27, %29 : vector<1x16x128xf32>
    %cst_13 = arith.constant 0.000000e+00 : f32
    %31 = vector.broadcast %cst_13 : f32 to vector<1x16x128xf32>
    %32 = arith.maximumf %30, %31 : vector<1x16x128xf32>
    %33 = arith.maximumf %23, %32 : vector<1x16x128xf32>
    %34 = vector.extract_strided_slice %33 {offsets = [0, 0, 0], sizes = [1, 1, 128], strides = [1, 1, 1]} : vector<1x16x128xf32> to vector<1x1x128xf32>
    %35 = vector.extract_strided_slice %33 {offsets = [0, 1, 0], sizes = [1, 1, 128], strides = [1, 1, 1]} : vector<1x16x128xf32> to vector<1x1x128xf32>
    %36 = arith.maximumf %34, %35 : vector<1x1x128xf32>
    %37 = vector.extract_strided_slice %33 {offsets = [0, 2, 0], sizes = [1, 1, 128], strides = [1, 1, 1]} : vector<1x16x128xf32> to vector<1x1x128xf32>
    %38 = vector.extract_strided_slice %33 {offsets = [0, 3, 0], sizes = [1, 1, 128], strides = [1, 1, 1]} : vector<1x16x128xf32> to vector<1x1x128xf32>
    %39 = arith.maximumf %37, %38 : vector<1x1x128xf32>
    %40 = vector.extract_strided_slice %33 {offsets = [0, 4, 0], sizes = [1, 1, 128], strides = [1, 1, 1]} : vector<1x16x128xf32> to vector<1x1x128xf32>
    %41 = vector.extract_strided_slice %33 {offsets = [0, 5, 0], sizes = [1, 1, 128], strides = [1, 1, 1]} : vector<1x16x128xf32> to vector<1x1x128xf32>
    %42 = arith.maximumf %40, %41 : vector<1x1x128xf32>
    %43 = vector.extract_strided_slice %33 {offsets = [0, 6, 0], sizes = [1, 1, 128], strides = [1, 1, 1]} : vector<1x16x128xf32> to vector<1x1x128xf32>
    %44 = vector.extract_strided_slice %33 {offsets = [0, 7, 0], sizes = [1, 1, 128], strides = [1, 1, 1]} : vector<1x16x128xf32> to vector<1x1x128xf32>
    %45 = arith.maximumf %43, %44 : vector<1x1x128xf32>
    %46 = vector.extract_strided_slice %33 {offsets = [0, 8, 0], sizes = [1, 1, 128], strides = [1, 1, 1]} : vector<1x16x128xf32> to vector<1x1x128xf32>
    %47 = vector.extract_strided_slice %33 {offsets = [0, 9, 0], sizes = [1, 1, 128], strides = [1, 1, 1]} : vector<1x16x128xf32> to vector<1x1x128xf32>
    %48 = arith.maximumf %46, %47 : vector<1x1x128xf32>
    %49 = vector.extract_strided_slice %33 {offsets = [0, 10, 0], sizes = [1, 1, 128], strides = [1, 1, 1]} : vector<1x16x128xf32> to vector<1x1x128xf32>
    %50 = vector.extract_strided_slice %33 {offsets = [0, 11, 0], sizes = [1, 1, 128], strides = [1, 1, 1]} : vector<1x16x128xf32> to vector<1x1x128xf32>
    %51 = arith.maximumf %49, %50 : vector<1x1x128xf32>
    %52 = vector.extract_strided_slice %33 {offsets = [0, 12, 0], sizes = [1, 1, 128], strides = [1, 1, 1]} : vector<1x16x128xf32> to vector<1x1x128xf32>
    %53 = vector.extract_strided_slice %33 {offsets = [0, 13, 0], sizes = [1, 1, 128], strides = [1, 1, 1]} : vector<1x16x128xf32> to vector<1x1x128xf32>
    %54 = arith.maximumf %52, %53 : vector<1x1x128xf32>
    %55 = vector.extract_strided_slice %33 {offsets = [0, 14, 0], sizes = [1, 1, 128], strides = [1, 1, 1]} : vector<1x16x128xf32> to vector<1x1x128xf32>
    %56 = vector.extract_strided_slice %33 {offsets = [0, 15, 0], sizes = [1, 1, 128], strides = [1, 1, 1]} : vector<1x16x128xf32> to vector<1x1x128xf32>
    %57 = arith.maximumf %55, %56 : vector<1x1x128xf32>
    %58 = tpu.concatenate %36, %39, %42, %45, %48, %51, %54, %57 in 1 : vector<1x1x128xf32>, vector<1x1x128xf32>, vector<1x1x128xf32>, vector<1x1x128xf32>, vector<1x1x128xf32>, vector<1x1x128xf32>, vector<1x1x128xf32>, vector<1x1x128xf32> -> vector<1x8x128xf32>
    %59 = vector.shape_cast %58 : vector<1x8x128xf32> to vector<8x128xf32>
    %60 = arith.truncf %59 : vector<8x128xf32> to vector<8x128xbf16>
    %c0_14 = arith.constant 0 : index
    %c0_15 = arith.constant 0 : index
    %c0_16 = arith.constant 0 : index
    %61 = vector.load %arg5[%c0_14, %c0_15, %c0_16] : memref<2x128x256xbf16, #tpu.memory_space<vmem>>, vector<1x128x256xbf16>
    %62 = vector.shape_cast %61 : vector<1x128x256xbf16> to vector<128x256xbf16>
    %cst_17 = arith.constant dense<0.000000e+00> : vector<8x256xf32>
    %63 = tpu.matmul %60, %62, %cst_17 {dimension_numbers = #tpu.dot_dimension_numbers<[1], [0], [0], [1], [0, 0, 1, 1], [], []>} : vector<8x128xbf16>, vector<128x256xbf16>, vector<8x256xf32> -> vector<8x256xf32>
    %c1_18 = arith.constant 1 : index
    %c0_19 = arith.constant 0 : index
    %c0_20 = arith.constant 0 : index
    %64 = vector.load %arg5[%c1_18, %c0_19, %c0_20] : memref<2x128x256xbf16, #tpu.memory_space<vmem>>, vector<1x128x256xbf16>
    %65 = vector.shape_cast %64 : vector<1x128x256xbf16> to vector<128x256xbf16>
    %cst_21 = arith.constant dense<0.000000e+00> : vector<8x256xf32>
    %66 = tpu.matmul %60, %65, %cst_21 {dimension_numbers = #tpu.dot_dimension_numbers<[1], [0], [0], [1], [0, 0, 1, 1], [], []>} : vector<8x128xbf16>, vector<128x256xbf16>, vector<8x256xf32> -> vector<8x256xf32>
    %67 = vector.shape_cast %63 : vector<8x256xf32> to vector<1x8x256xf32>
    %68 = vector.shape_cast %66 : vector<8x256xf32> to vector<1x8x256xf32>
    %cst_22 = arith.constant 0.000000e+00 : f32
    %69 = vector.broadcast %cst_22 : f32 to vector<1x1x256xf32>
    %70 = vector.extract_strided_slice %67 {offsets = [0, 0, 0], sizes = [1, 7, 256], strides = [1, 1, 1]} : vector<1x8x256xf32> to vector<1x7x256xf32>
    %71 = tpu.concatenate %69, %70 in 1 : vector<1x1x256xf32>, vector<1x7x256xf32> -> vector<1x8x256xf32>
    %72 = arith.addf %68, %71 : vector<1x8x256xf32>
    %c0_23 = arith.constant 0 : index
    %c0_24 = arith.constant 0 : index
    %73 = vector.load %arg6[%c0_23, %c0_24] : memref<1x128xf32, #tpu.memory_space<vmem>>, vector<1x128xf32>
    %c0_25 = arith.constant 0 : index
    %c0_26 = arith.constant 0 : index
    %74 = vector.load %arg7[%c0_25, %c0_26] : memref<1x128xf32, #tpu.memory_space<vmem>>, vector<1x128xf32>
    %75 = vector.extract_strided_slice %72 {offsets = [0, 0, 0], sizes = [1, 8, 128], strides = [1, 1, 1]} : vector<1x8x256xf32> to vector<1x8x128xf32>
    %76 = vector.shape_cast %73 : vector<1x128xf32> to vector<1x1x128xf32>
    %77 = vector.broadcast %76 : vector<1x1x128xf32> to vector<1x8x128xf32>
    %78 = arith.mulf %75, %77 : vector<1x8x128xf32>
    %79 = vector.shape_cast %74 : vector<1x128xf32> to vector<1x1x128xf32>
    %80 = vector.broadcast %79 : vector<1x1x128xf32> to vector<1x8x128xf32>
    %81 = arith.addf %78, %80 : vector<1x8x128xf32>
    %cst_27 = arith.constant 0.000000e+00 : f32
    %82 = vector.broadcast %cst_27 : f32 to vector<1x8x128xf32>
    %83 = arith.maximumf %81, %82 : vector<1x8x128xf32>
    %84 = vector.extract_strided_slice %72 {offsets = [0, 0, 128], sizes = [1, 8, 128], strides = [1, 1, 1]} : vector<1x8x256xf32> to vector<1x8x128xf32>
    %85 = vector.shape_cast %73 : vector<1x128xf32> to vector<1x1x128xf32>
    %86 = vector.broadcast %85 : vector<1x1x128xf32> to vector<1x8x128xf32>
    %87 = arith.mulf %84, %86 : vector<1x8x128xf32>
    %88 = vector.shape_cast %74 : vector<1x128xf32> to vector<1x1x128xf32>
    %89 = vector.broadcast %88 : vector<1x1x128xf32> to vector<1x8x128xf32>
    %90 = arith.addf %87, %89 : vector<1x8x128xf32>
    %cst_28 = arith.constant 0.000000e+00 : f32
    %91 = vector.broadcast %cst_28 : f32 to vector<1x8x128xf32>
    %92 = arith.maximumf %90, %91 : vector<1x8x128xf32>
    %93 = arith.maximumf %83, %92 : vector<1x8x128xf32>
    %cst_29 = arith.constant 0.000000e+00 : f32
    %94 = vector.broadcast %cst_29 : f32 to vector<1x3xf32>
    %95 = vector.extract_strided_slice %93 {offsets = [0, 0, 0], sizes = [1, 1, 128], strides = [1, 1, 1]} : vector<1x8x128xf32> to vector<1x1x128xf32>
    %96 = vector.shape_cast %95 : vector<1x1x128xf32> to vector<1x128xf32>
    %97 = vector.extract_strided_slice %93 {offsets = [0, 1, 0], sizes = [1, 1, 128], strides = [1, 1, 1]} : vector<1x8x128xf32> to vector<1x1x128xf32>
    %98 = vector.shape_cast %97 : vector<1x1x128xf32> to vector<1x128xf32>
    %99 = arith.maximumf %96, %98 : vector<1x128xf32>
    %100 = arith.truncf %99 : vector<1x128xf32> to vector<1x128xbf16>
    %c0_30 = arith.constant 0 : index
    %c0_31 = arith.constant 0 : index
    %c0_32 = arith.constant 0 : index
    %101 = vector.load %arg8[%c0_30, %c0_31, %c0_32] : memref<4x128x3xbf16, #tpu.memory_space<vmem>>, vector<1x128x3xbf16>
    %102 = vector.shape_cast %101 : vector<1x128x3xbf16> to vector<128x3xbf16>
    %cst_33 = arith.constant dense<0.000000e+00> : vector<1x3xf32>
    %103 = tpu.matmul %100, %102, %cst_33 {dimension_numbers = #tpu.dot_dimension_numbers<[1], [0], [0], [1], [0, 0, 1, 1], [], []>} : vector<1x128xbf16>, vector<128x3xbf16>, vector<1x3xf32> -> vector<1x3xf32>
    %104 = arith.addf %94, %103 : vector<1x3xf32>
    %105 = vector.extract_strided_slice %93 {offsets = [0, 2, 0], sizes = [1, 1, 128], strides = [1, 1, 1]} : vector<1x8x128xf32> to vector<1x1x128xf32>
    %106 = vector.shape_cast %105 : vector<1x1x128xf32> to vector<1x128xf32>
    %107 = vector.extract_strided_slice %93 {offsets = [0, 3, 0], sizes = [1, 1, 128], strides = [1, 1, 1]} : vector<1x8x128xf32> to vector<1x1x128xf32>
    %108 = vector.shape_cast %107 : vector<1x1x128xf32> to vector<1x128xf32>
    %109 = arith.maximumf %106, %108 : vector<1x128xf32>
    %110 = arith.truncf %109 : vector<1x128xf32> to vector<1x128xbf16>
    %c1_34 = arith.constant 1 : index
    %c0_35 = arith.constant 0 : index
    %c0_36 = arith.constant 0 : index
    %111 = vector.load %arg8[%c1_34, %c0_35, %c0_36] : memref<4x128x3xbf16, #tpu.memory_space<vmem>>, vector<1x128x3xbf16>
    %112 = vector.shape_cast %111 : vector<1x128x3xbf16> to vector<128x3xbf16>
    %cst_37 = arith.constant dense<0.000000e+00> : vector<1x3xf32>
    %113 = tpu.matmul %110, %112, %cst_37 {dimension_numbers = #tpu.dot_dimension_numbers<[1], [0], [0], [1], [0, 0, 1, 1], [], []>} : vector<1x128xbf16>, vector<128x3xbf16>, vector<1x3xf32> -> vector<1x3xf32>
    %114 = arith.addf %104, %113 : vector<1x3xf32>
    %115 = vector.extract_strided_slice %93 {offsets = [0, 4, 0], sizes = [1, 1, 128], strides = [1, 1, 1]} : vector<1x8x128xf32> to vector<1x1x128xf32>
    %116 = vector.shape_cast %115 : vector<1x1x128xf32> to vector<1x128xf32>
    %117 = vector.extract_strided_slice %93 {offsets = [0, 5, 0], sizes = [1, 1, 128], strides = [1, 1, 1]} : vector<1x8x128xf32> to vector<1x1x128xf32>
    %118 = vector.shape_cast %117 : vector<1x1x128xf32> to vector<1x128xf32>
    %119 = arith.maximumf %116, %118 : vector<1x128xf32>
    %120 = arith.truncf %119 : vector<1x128xf32> to vector<1x128xbf16>
    %c2 = arith.constant 2 : index
    %c0_38 = arith.constant 0 : index
    %c0_39 = arith.constant 0 : index
    %121 = vector.load %arg8[%c2, %c0_38, %c0_39] : memref<4x128x3xbf16, #tpu.memory_space<vmem>>, vector<1x128x3xbf16>
    %122 = vector.shape_cast %121 : vector<1x128x3xbf16> to vector<128x3xbf16>
    %cst_40 = arith.constant dense<0.000000e+00> : vector<1x3xf32>
    %123 = tpu.matmul %120, %122, %cst_40 {dimension_numbers = #tpu.dot_dimension_numbers<[1], [0], [0], [1], [0, 0, 1, 1], [], []>} : vector<1x128xbf16>, vector<128x3xbf16>, vector<1x3xf32> -> vector<1x3xf32>
    %124 = arith.addf %114, %123 : vector<1x3xf32>
    %125 = vector.extract_strided_slice %93 {offsets = [0, 6, 0], sizes = [1, 1, 128], strides = [1, 1, 1]} : vector<1x8x128xf32> to vector<1x1x128xf32>
    %126 = vector.shape_cast %125 : vector<1x1x128xf32> to vector<1x128xf32>
    %127 = vector.extract_strided_slice %93 {offsets = [0, 7, 0], sizes = [1, 1, 128], strides = [1, 1, 1]} : vector<1x8x128xf32> to vector<1x1x128xf32>
    %128 = vector.shape_cast %127 : vector<1x1x128xf32> to vector<1x128xf32>
    %129 = arith.maximumf %126, %128 : vector<1x128xf32>
    %130 = arith.truncf %129 : vector<1x128xf32> to vector<1x128xbf16>
    %c3 = arith.constant 3 : index
    %c0_41 = arith.constant 0 : index
    %c0_42 = arith.constant 0 : index
    %131 = vector.load %arg8[%c3, %c0_41, %c0_42] : memref<4x128x3xbf16, #tpu.memory_space<vmem>>, vector<1x128x3xbf16>
    %132 = vector.shape_cast %131 : vector<1x128x3xbf16> to vector<128x3xbf16>
    %cst_43 = arith.constant dense<0.000000e+00> : vector<1x3xf32>
    %133 = tpu.matmul %130, %132, %cst_43 {dimension_numbers = #tpu.dot_dimension_numbers<[1], [0], [0], [1], [0, 0, 1, 1], [], []>} : vector<1x128xbf16>, vector<128x3xbf16>, vector<1x3xf32> -> vector<1x3xf32>
    %134 = arith.addf %124, %133 : vector<1x3xf32>
    %c0_44 = arith.constant 0 : index
    %c0_45 = arith.constant 0 : index
    %135 = vector.load %arg9[%c0_44, %c0_45] : memref<1x3xf32, #tpu.memory_space<vmem>>, vector<1x3xf32>
    %136 = arith.addf %134, %135 : vector<1x3xf32>
    %137 = vector.shape_cast %136 : vector<1x3xf32> to vector<1x1x3xf32>
    %c0_46 = arith.constant 0 : index
    %c0_47 = arith.constant 0 : index
    %c0_48 = arith.constant 0 : index
    %138 = vector.load %arg10[%c0_46, %c0_47, %c0_48] : memref<1x1x3xf32, #tpu.memory_space<vmem>>, vector<1x1x3xf32>
    tpu.vector_store %arg10[%c0_46, %c0_47, %c0_48], %137 {strides = array<i32>} : memref<1x1x3xf32, #tpu.memory_space<vmem>>, vector<1x1x3xf32>,
    return
  }
  func.func @transform_0(%arg0: i32) -> (i32, i32) {
    %c0_i32 = arith.constant 0 : i32
    %c0_i32_0 = arith.constant 0 : i32
    return %arg0, %c0_i32 : i32, i32
  }
  func.func @transform_1(%arg0: i32) -> (i32, i32, i32) {
    %c0_i32 = arith.constant 0 : i32
    %c0_i32_0 = arith.constant 0 : i32
    %c0_i32_1 = arith.constant 0 : i32
    %c0_i32_2 = arith.constant 0 : i32
    return %c0_i32, %c0_i32_0, %c0_i32_1 : i32, i32, i32
  }
  func.func @transform_2(%arg0: i32) -> (i32, i32) {
    %c0_i32 = arith.constant 0 : i32
    %c0_i32_0 = arith.constant 0 : i32
    %c0_i32_1 = arith.constant 0 : i32
    return %c0_i32, %c0_i32_0 : i32, i32
  }
  func.func @transform_3(%arg0: i32) -> (i32, i32) {
    %c0_i32 = arith.constant 0 : i32
    %c0_i32_0 = arith.constant 0 : i32
    %c0_i32_1 = arith.constant 0 : i32
    return %c0_i32, %c0_i32_0 : i32, i32
  }
  func.func @transform_4(%arg0: i32) -> (i32, i32, i32) {
    %c0_i32 = arith.constant 0 : i32
    %c0_i32_0 = arith.constant 0 : i32
    %c0_i32_1 = arith.constant 0 : i32
    %c0_i32_2 = arith.constant 0 : i32
    return %c0_i32, %c0_i32_0, %c0_i32_1 : i32, i32, i32
  }
  func.func @transform_5(%arg0: i32) -> (i32, i32) {
    %c0_i32 = arith.constant 0 : i32
    %c0_i32_0 = arith.constant 0 : i32
    %c0_i32_1 = arith.constant 0 : i32
    return %c0_i32, %c0_i32_0 : i32, i32
  }
  func.func @transform_6(%arg0: i32) -> (i32, i32) {
    %c0_i32 = arith.constant 0 : i32
    %c0_i32_0 = arith.constant 0 : i32
    %c0_i32_1 = arith.constant 0 : i32
    return %c0_i32, %c0_i32_0 : i32, i32
  }
  func.func @transform_7(%arg0: i32) -> (i32, i32, i32) {
    %c0_i32 = arith.constant 0 : i32
    %c0_i32_0 = arith.constant 0 : i32
    %c0_i32_1 = arith.constant 0 : i32
    %c0_i32_2 = arith.constant 0 : i32
    return %c0_i32, %c0_i32_0, %c0_i32_1 : i32, i32, i32
  }
  func.func @transform_8(%arg0: i32) -> (i32, i32) {
    %c0_i32 = arith.constant 0 : i32
    %c0_i32_0 = arith.constant 0 : i32
    %c0_i32_1 = arith.constant 0 : i32
    return %c0_i32, %c0_i32_0 : i32, i32
  }
  func.func @transform_9(%arg0: i32) -> (i32, i32, i32) {
    %c0_i32 = arith.constant 0 : i32
    %c0_i32_0 = arith.constant 0 : i32
    %c0_i32_1 = arith.constant 0 : i32
    return %arg0, %c0_i32, %c0_i32_0 : i32, i32, i32
  }
}

</mosaic_0001>

<bundles_post_ra>
// kernel: tile.23
= control target key start
LH: loop header
LB: loop body
LE: loop exit
PB: predicated region body
PF: predicated region fallthrough
CT: control target
= control target key end

     0   :  { %s22_s0 = inlined_call_operand.vmem [shape: f32[16], index: 0, kind: input, shape index: {}]   ;;  %s23_s1 = inlined_call_operand.vmem [shape: f32[8,16], index: 1, kind: output, shape index: {}]  }
   0x1   :  { %v4_v0 = vld [vmem:[%s22_s0] ss:$0 sm:$0xff] }
   0x2   :  { %5 = vst [vmem:[%s23_s1] sm:$0xff] %v4_v0 }

// kernel: tile.24
= control target key start
LH: loop header
LB: loop body
LE: loop exit
PB: predicated region body
PF: predicated region fallthrough
CT: control target
= control target key end

     0   :  { %s67_s10 = smov 112   ;;  %s68_s11 = smov 80   ;;  %vm3_vm0 = vcmask 130048   ;;  %vm9_vm1 = vcmask 1048448   ;;  %vm15_vm2 = vcmask 917248   ;;  %vm21_vm3 = vcmask 786048   ;;  %s111_s0 = inlined_call_operand.vmem [shape: f32[8,16], index: 0, kind: input, shape index: {}]   ;;  %s112_s1 = inlined_call_operand.vmem [shape: f32[1,128], index: 1, kind: output, shape index: {}]  }
   0x1   :  { %v53_v0 = vld [vmem:[%s111_s0 + $0x7] sm:$0x1]   ;;  %v55_v1 = vld [vmem:[%s111_s0 + $0x5] sm:$0x1]   ;;  %v54_v2 = vld [vmem:[%s111_s0 + $0x6] sm:$0x1]  }
   0x2   :  { %7 = vrot.lane.b32.xlu0 %v53_v0, %s67_s10  ;;  %19 = vrot.lane.b32.xlu1 %v55_v1, %s68_s11  ;;  %v56_v3 = vld [vmem:[%s111_s0 + $0x4] sm:$0x1]   ;;  %v2_v4 = vld [vmem:[%s111_s0] sm:$0x1]   ;;  %s69_s18 = smov 96   ;;  %s70_s19 = smov 64  }
   0x3   :  { %4 = vst.msk [vmem:[#allocation0] sm:$0x1] %vm3_vm0, %v2_v4   ;;  %v57_v5 = vld [vmem:[%s111_s0 + $0x3] sm:$0x1]   ;;  %v58_v6 = vld [vmem:[%s111_s0 + $0x2] sm:$0x1]  }
   0x4   :  { %s71_s24 = smov 48   ;;  %s72_s25 = smov 32   ;;  %v59_v7 = vld [vmem:[%s111_s0 + $0x1] sm:$0x1]   ;;  %vm27_vm4 = vcmask 654848   ;;  %vm33_vm5 = vcmask 523648  }
   0x5   :  { %s73_s0 = smov 16   ;;  %vm39_vm6 = vcmask 392448   ;;  %vm45_vm7 = vcmask 261248  }
   0x6   :  { %13 = vrot.lane.b32.xlu0 %v54_v2, %s69_s18  ;;  %25 = vrot.lane.b32.xlu1 %v56_v3, %s70_s19 }
   0xa   :  { %31 = vrot.lane.b32.xlu0 %v57_v5, %s71_s24  ;;  %37 = vrot.lane.b32.xlu1 %v58_v6, %s72_s25 }
   0xe   :  { %43 = vrot.lane.b32.xlu0 %v59_v7, %s73_s0 }
  0x74   :  { %v8_v8 = vpop.permute.xlu0 %7   ;;  %v20_v9 = vpop.permute.xlu1 %19  }
  0x75   :  { %10 = vst.msk [vmem:[#allocation0] sm:$0x1] %vm9_vm1, %v8_v8  }
  0x78   :  { %v14_v10 = vpop.permute.xlu0 %13   ;;  %v26_v11 = vpop.permute.xlu1 %25  }
  0x79   :  { %16 = vst.msk [vmem:[#allocation0] sm:$0x1] %vm15_vm2, %v14_v10  }
  0x7a   :  { %22 = vst.msk [vmem:[#allocation0] sm:$0x1] %vm21_vm3, %v20_v9  }
  0x7b   :  { %28 = vst.msk [vmem:[#allocation0] sm:$0x1] %vm27_vm4, %v26_v11  }
  0x7c   :  { %v32_v12 = vpop.permute.xlu0 %31   ;;  %v38_v13 = vpop.permute.xlu1 %37  }
  0x7d   :  { %34 = vst.msk [vmem:[#allocation0] sm:$0x1] %vm33_vm5, %v32_v12  }
  0x7e   :  { %40 = vst.msk [vmem:[#allocation0] sm:$0x1] %vm39_vm6, %v38_v13  }
  0x80   :  { %v44_v14 = vpop.permute.xlu0 %43  }
  0x81   :  { %46 = vst.msk [vmem:[#allocation0] sm:$0x1] %vm45_vm7, %v44_v14  }
  0x88   :  { %v50_v15 = vld [vmem:[#allocation0] sm:$0x1] }
  0x89   :  { %52 = vst [vmem:[%s112_s1] sm:$0x1] %v50_v15 }

// kernel: tile.33
= control target key start
LH: loop header
LB: loop body
LE: loop exit
PB: predicated region body
PF: predicated region fallthrough
CT: control target
= control target key end

     0   :  { %s22_s0 = inlined_call_operand.vmem [shape: f32[32], index: 0, kind: input, shape index: {}]   ;;  %s23_s1 = inlined_call_operand.vmem [shape: f32[4,32], index: 1, kind: output, shape index: {}]  }
   0x1   :  { %v4_v0 = vld [vmem:[%s22_s0] ss:$0 sm:$0xff] }
   0x2   :  { %5 = vst [vmem:[%s23_s1] sm:$0xf] %v4_v0 }

// kernel: tile.34
= control target key start
LH: loop header
LB: loop body
LE: loop exit
PB: predicated region body
PF: predicated region fallthrough
CT: control target
= control target key end

     0   :  { %vm7_vm0 = vcmask 261120   ;;  %s37_s8 = smov 32   ;;  %s38_s9 = smov 64   ;;  %vm13_vm1 = vcmask 1048320   ;;  %vm19_vm2 = vcmask 785920   ;;  %vm25_vm3 = vcmask 523520   ;;  %s55_s0 = inlined_call_operand.vmem [shape: f32[4,32], index: 0, kind: input, shape index: {}]   ;;  %s56_s1 = inlined_call_operand.vmem [shape: f32[1,128], index: 1, kind: output, shape index: {}]  }
   0x1   :  { %v4_v0 = vld [vmem:[%s55_s0] sm:$0xf]  ;;  %s36_s0 = smov 96  }
   0x2   :  { %5 = vst [vmem:[#allocation1] sm:$0xf] %v4_v0 }
   0x9   :  { %v10_v1 = vld [vmem:[#allocation1 + $0x3] sm:$0x1]   ;;  %v22_v2 = vld [vmem:[#allocation1 + $0x1] sm:$0x1]   ;;  %v6_v3 = vld [vmem:[#allocation1] sm:$0x1]  }
   0xa   :  { %11 = vrot.lane.b32.xlu0 %v10_v1, %s36_s0  ;;  %23 = vrot.lane.b32.xlu1 %v22_v2, %s37_s8  ;;  %v16_v4 = vld [vmem:[#allocation1 + $0x2] sm:$0x1]   ;;  %8 = vst.msk [vmem:[#allocation0] sm:$0x1] %vm7_vm0, %v6_v3  }
   0xe   :  { %17 = vrot.lane.b32.xlu0 %v16_v4, %s38_s9 }
  0x7c   :  { %v12_v5 = vpop.permute.xlu0 %11   ;;  %v24_v6 = vpop.permute.xlu1 %23  }
  0x7d   :  { %14 = vst.msk [vmem:[#allocation0] sm:$0x1] %vm13_vm1, %v12_v5  }
  0x80   :  { %v18_v7 = vpop.permute.xlu0 %17  }
  0x81   :  { %20 = vst.msk [vmem:[#allocation0] sm:$0x1] %vm19_vm2, %v18_v7  }
  0x82   :  { %26 = vst.msk [vmem:[#allocation0] sm:$0x1] %vm25_vm3, %v24_v6  }
  0x89   :  { %v30_v8 = vld [vmem:[#allocation0] sm:$0x1] }
  0x8a   :  { %32 = vst [vmem:[%s56_s1] sm:$0x1] %v30_v8 }

// kernel: cnn_forward.1
= control target key start
LH: loop header
LB: loop body
LE: loop exit
PB: predicated region body
PF: predicated region fallthrough
CT: control target
= control target key end

     0   :  { %14 = vsyncpa [#allocation3], 0  ;;  %s2231_s0 = inlined_call_operand.vmem [shape: bf16[32,16], index: 0, kind: input, shape index: {}]   ;;  %s2232_s1 = inlined_call_operand.vmem [shape: bf16[2,16,256], index: 1, kind: input, shape index: {}]   ;;  %s2233_s2 = inlined_call_operand.vmem [shape: f32[1,128], index: 2, kind: input, shape index: {}]   ;;  %s2234_s3 = inlined_call_operand.vmem [shape: f32[1,128], index: 3, kind: input, shape index: {}]   ;;  %s2235_s4 = inlined_call_operand.vmem [shape: bf16[2,128,256], index: 4, kind: input, shape index: {}]   ;;  %s2236_s5 = inlined_call_operand.vmem [shape: f32[1,128], index: 5, kind: input, shape index: {}]   ;;  %s2237_s6 = inlined_call_operand.vmem [shape: f32[1,128], index: 6, kind: input, shape index: {}]   ;;  %s2238_s7 = inlined_call_operand.vmem [shape: bf16[4,128,3], index: 7, kind: input, shape index: {}]   ;;  %s2239_s8 = inlined_call_operand.vmem [shape: f32[1,3], index: 8, kind: input, shape index: {}]   ;;  %s2240_s9 = inlined_call_operand.hbm [shape: f32[2,1,3], index: 9, kind: output, shape index: {}]  }
   0x1   :  { %16 = vsyncpa [#allocation3 + $0x1], 0  ;;  %s1866_s30 = smov 0   ;;  %s1868_s10 = smov 0  }
   0x2   :  { %s1870_s11 = smov 0   ;;  %s1872_s12 = smov 0  }
   0x3 LB: > { %s1887_s13 = sadd.s32 4294967295, %s1810_s12   ;;  %s1353_s14 = sadd.s32 4294967294, %s1810_s12   ;;  %s1810_s12 = sphi %s1872_s12, %s2246_s12   ;;  %s1806_s11 = sphi %s1870_s11, %s2245_s11   ;;  %s1802_s10 = sphi %s1868_s10, %s2244_s10   ;;  %s1798_s30 = sphi %s1866_s30, %s2243_s30  }
   0x4   : > { %s1891_s15 = sadd.s32 1, %s1810_s12   ;;  %s223_s16 = sadd.s32 1, %s1806_s11 }
   0x5   : > { %s220_s17 = ssub.s32 %s1810_s12, %s1891_s15  ;;  %p233_p0 = scmp.ne.s32.totalorder %s1806_s11, %s1802_s10 }
   0x6   : > { %p221_p1 = scmp.eq.s32.totalorder %s220_s17, 0  ;;  %p234_p2 = scmp.eq.s32.totalorder %s1887_s13, 1 }
   0x7   : > { %p239_p3 = scmp.ne.s32.totalorder %s1802_s10, %s1798_s30  ;;  %p240_p4 = scmp.eq.s32.totalorder %s1353_s14, 1 }
   0x8   : > { %s1902_s18 = scalar_select %p221_p1, %s1806_s11, %s223_s16  }
   0x9   : > { %p1904_p5 = por %p234_p2, %p233_p0  ;;  %p1908_p6 = por %p240_p4, %p239_p3 }
   0xa   : > { %p1356_p7 = scmp.ge.s32.totalorder %s1810_s12, 1  ;;  %p291_p8 = scmp.lt.s32.totalorder %s1810_s12, 3 }
   0xc   : > { %p292_p9 = pnand %p1356_p7, %p291_p8 }
   0xd   : > { %v1661_v0 = vld [vmem:[%s2232_s1 + $0x4] ss:$8 sps:$4 sm:$0xff] (!%p292_p9)   ;;  %s1357_s23 = sshll.u32 (!%p292_p9), %s1887_s13, 1  ;;  %v1663_v1 = vld [vmem:[%s2232_s1 + $0x14] ss:$8 sps:$4 sm:$0xff] (!%p292_p9)   ;;  %v1812_v2 = vmov (!%p292_p9), 0  }
   0xe   : > { %295 = sbr.rel (%p292_p9) target bundleno = 764 (0x2fc), region = 56  ;;  %388 = vmatprep.mubr.bf16.mxu0 (!%p292_p9), %v1812_v2  ;;  %444 = vmatprep.mubr.bf16.mxu1 (!%p292_p9), %v1812_v2  ;;  %p327_p10 = scmp.lt.s32.totalorder (!%p292_p9), %s1357_s23, 3  ;;  %v1665_v3 = vld [vmem:[%s2232_s1] ss:$8 sps:$4 sm:$0xff] (!%p292_p9)   ;;  %v1666_v4 = vld [vmem:[%s2232_s1 + $0x10] ss:$8 sps:$4 sm:$0xff] (!%p292_p9)  }
   0xf   : > { %356 = vmatprep.subr.bf16.mxu0 (!%p292_p9), %v1661_v0  ;;  %412 = vmatprep.subr.bf16.mxu1 (!%p292_p9), %v1663_v1  ;;  %v1670_v5 = vld [vmem:[%s2235_s4 + $0x4] ss:$8 sps:$4 sm:$0xff] (!%p292_p9)   ;;  %v1668_v6 = vld [vmem:[%s2235_s4] ss:$8 sps:$4 sm:$0xff] (!%p292_p9)   ;;  %vm352_vm0 = vcmask (!%p292_p9), 130048   ;;  %v1813_v38 = vmov (!%p292_p9), 0.0  }
  0x10   : > { %357 = vmatpush1.bf16.msra.mxu0 (!%p292_p9), %v1665_v3  ;;  %413 = vmatpush1.bf16.msra.mxu1 (!%p292_p9), %v1666_v4  ;;  %v1671_v7 = vld [vmem:[%s2235_s4 + $0x80] ss:$8 sps:$4 sm:$0xff] (!%p292_p9)   ;;  %v1673_v8 = vld [vmem:[%s2235_s4 + $0x84] ss:$8 sps:$4 sm:$0xff] (!%p292_p9)   ;;  %v1676_v10 = vld [vmem:[%s2235_s4 + $0x14] ss:$8 sps:$4 sm:$0xff] (!%p292_p9)  }
  0x11   : > { %638 = vmatprep.subr.bf16.mxu0 (!%p292_p9), %v1670_v5  ;;  %776 = vmatprep.subr.bf16.mxu1 (!%p292_p9), %v1673_v8  ;;  %v1679_v11 = vld [vmem:[%s2235_s4 + $0x94] ss:$8 sps:$4 sm:$0xff] (!%p292_p9)   ;;  %v1674_v12 = vld [vmem:[%s2235_s4 + $0x10] ss:$8 sps:$4 sm:$0xff] (!%p292_p9)   ;;  %v1682_v14 = vld [vmem:[%s2235_s4 + $0x24] ss:$8 sps:$4 sm:$0xff] (!%p292_p9)  }
  0x12   : > { %v1677_v13 = vld [vmem:[%s2235_s4 + $0x90] ss:$8 sps:$4 sm:$0xff] (!%p292_p9)   ;;  %v1680_v15 = vld [vmem:[%s2235_s4 + $0x20] ss:$8 sps:$4 sm:$0xff] (!%p292_p9)   ;;  %v1685_v17 = vld [vmem:[%s2235_s4 + $0xa4] ss:$8 sps:$4 sm:$0xff] (!%p292_p9)  }
  0x13   : > { %v1683_v16 = vld [vmem:[%s2235_s4 + $0xa0] ss:$8 sps:$4 sm:$0xff] (!%p292_p9)   ;;  %v1688_v18 = vld [vmem:[%s2235_s4 + $0x34] ss:$8 sps:$4 sm:$0xff] (!%p292_p9)   ;;  %v1686_v20 = vld [vmem:[%s2235_s4 + $0x30] ss:$8 sps:$4 sm:$0xff] (!%p292_p9)  }
  0x14   : > { %v1691_v19 = vld [vmem:[%s2235_s4 + $0xb4] ss:$8 sps:$4 sm:$0xff] (!%p292_p9)   ;;  %v1689_v21 = vld [vmem:[%s2235_s4 + $0xb0] ss:$8 sps:$4 sm:$0xff] (!%p292_p9)   ;;  %v1694_v22 = vld [vmem:[%s2235_s4 + $0x44] ss:$8 sps:$4 sm:$0xff] (!%p292_p9)  }
  0x15   : > { %s2248_s23 = smov (!%p327_p10, %s1357_s23), 3  ;;  %v1697_v23 = vld [vmem:[%s2235_s4 + $0xc4] ss:$8 sps:$4 sm:$0xff]   ;;  %v1692_v24 = vld [vmem:[%s2235_s4 + $0x40] ss:$8 sps:$4 sm:$0xff]   ;;  %vm459_vm1 = vcmask 1040384  }
  0x16   : > { %s1358_s25 = sshll.u32 %s2248_s23, 2  ;;  %v1695_v25 = vld [vmem:[%s2235_s4 + $0xc0] ss:$8 sps:$4 sm:$0xff]   ;;  %v1700_v26 = vld [vmem:[%s2235_s4 + $0x54] ss:$8 sps:$4 sm:$0xff]   ;;  %vm529_vm2 = vcmask 1041408  }
  0x17   : > { %s330_s14 = scalar_lea.vmem %s2231_s0, %s1358_s25  ;;  %v1703_v27 = vld [vmem:[%s2235_s4 + $0xd4] ss:$8 sps:$4 sm:$0xff]   ;;  %v1698_v28 = vld [vmem:[%s2235_s4 + $0x50] ss:$8 sps:$4 sm:$0xff]   ;;  %v1706_v30 = vld [vmem:[%s2235_s4 + $0x64] ss:$8 sps:$4 sm:$0xff]  }
  0x18   : > { %v1667_v9 = vld [vmem:[%s330_s14] sm:$0xff]   ;;  %v1701_v29 = vld [vmem:[%s2235_s4 + $0xd0] ss:$8 sps:$4 sm:$0xff]   ;;  %v1712_v34 = vld [vmem:[%s2235_s4 + $0x74] ss:$8 sps:$4 sm:$0xff]   ;;  %vm531_vm3 = vcmask 1042432  }
  0x19   : > { %1362 = vmatmul.mubr.msk.bf16.vlgmr.msra.gmra.mrb[0].mxu0 %vm352_vm0, %v1667_v9  ;;  %1367 = vmatmul.mubr.msk.bf16.vlgmr.msra.gmra.mrb[0].mxu1 %vm352_vm0, %v1667_v9  ;;  %v1709_v31 = vld [vmem:[%s2235_s4 + $0xe4] ss:$8 sps:$4 sm:$0xff]   ;;  %v1704_v32 = vld [vmem:[%s2235_s4 + $0x60] ss:$8 sps:$4 sm:$0xff]   ;;  %v1715_v35 = vld [vmem:[%s2235_s4 + $0xf4] ss:$8 sps:$4 sm:$0xff]  }
  0x1a   : > { %639 = vmatpush1.bf16.msra.mxu0 %v1668_v6  ;;  %777 = vmatpush1.bf16.msra.mxu1 %v1671_v7  ;;  %v1707_v33 = vld [vmem:[%s2235_s4 + $0xe0] ss:$8 sps:$4 sm:$0xff]   ;;  %v1710_v36 = vld [vmem:[%s2235_s4 + $0x70] ss:$8 sps:$4 sm:$0xff]   ;;  %vm533_vm4 = vcmask 1043456   ;;  %vm535_vm5 = vcmask 1044480  }
  0x1b   : > { %670 = vmatprep.mubr.bf16.mxu0 %v1812_v2  ;;  %808 = vmatprep.mubr.bf16.mxu1 %v1812_v2  ;;  %v1713_v37 = vld [vmem:[%s2235_s4 + $0xf0] ss:$8 sps:$4 sm:$0xff]   ;;  %v1368_v48 = vld [vmem:[%s2233_s2] ss:$0 sm:$0xff]  ;;  %vm537_vm6 = vcmask 1045504   ;;  %vm539_vm7 = vcmask 1046528  }
  0x1c   : > { %640 = vmatprep.subr.bf16.mxu0 %v1676_v10  ;;  %778 = vmatprep.subr.bf16.mxu1 %v1679_v11  ;;  %v1369_v55 = vld [vmem:[%s2234_s3] ss:$0 sm:$0xff]  ;;  %vm1814_vm8 = vmmov 0   ;;  %s324_s27 = sand.u32 1, %s1802_s10   ;;  %s1500_s14 = sshll.u32 %s1887_s13, 4  ;;  %vm1283_vm9 = vcmask 16384  }
  0x1d   : > { %s325_s16 = scalar_lea.vmem [#allocation2], %s324_s27  ;;  %s2189_s22 = scalar_lea.hbm %s2240_s9, %s1500_s14 }
  0x1e   : > { %641 = vmatpush1.bf16.msra.mxu0 %v1674_v12  ;;  %779 = vmatpush1.bf16.msra.mxu1 %v1677_v13  ;;  %s1298_s23 = sshll.u32 %s325_s16, 4  ;;  %s1286_s24 = scalar_lea.sflag [#allocation3], %s324_s27  ;;  %s2191_s23 = int_to_ptr.vmem [resolvable:$true] %s1298_s23 }
  0x1f   : > { %642 = vmatprep.subr.bf16.mxu0 %v1682_v14  ;;  %780 = vmatprep.subr.bf16.mxu1 %v1685_v17  ;;  %s1748_s25 = scalar_lea.vmem %s2191_s23, 16  ;;  %s1815_s13 = smov [#allocation2]  }
  0x20   : > { %p1749_p11 = scmp.ne.s32.totalorder %s2191_s23, %s1748_s25  ;;  %s1752_s26 = sshll.u32 %s1815_s13, 4  ;;  %s1753_s26 = int_to_ptr.vmem [resolvable:$false] %s1752_s26 }
  0x21   : > { %s1754_s28 = scalar_lea.vmem %s1753_s26, 32  ;;  %p1755_p0 = scmp.lt.s32.totalorder %s2191_s23, %s1753_s26 }
  0x22   : > { %643 = vmatpush1.bf16.msra.mxu0 %v1680_v15  ;;  %781 = vmatpush1.bf16.msra.mxu1 %v1683_v16  ;;  %p1750_p12 = pnand %p1749_p11, %p1904_p5  ;;  %p1756_p1 = scmp.lt.s32.totalorder %s1754_s28, %s1748_s25 }
  0x23   : > { %644 = vmatprep.subr.bf16.mxu0 %v1688_v18  ;;  %782 = vmatprep.subr.bf16.mxu1 %v1691_v19 }
  0x24   : > { %p1751_p13 = pneg %p1750_p12  ;;  %p1757_p2 = por %p1756_p1, %p1755_p0 }
  0x26   : > { %645 = vmatpush1.bf16.msra.mxu0 %v1686_v20  ;;  %783 = vmatpush1.bf16.msra.mxu1 %v1689_v21  ;;  %p1758_p3 = pnand %p1757_p2, %p1751_p13 }
  0x27   : > { %646 = vmatprep.subr.bf16.mxu0 %v1694_v22  ;;  %784 = vmatprep.subr.bf16.mxu1 %v1697_v23 }
  0x2a   : > { %647 = vmatpush1.bf16.msra.mxu0 %v1692_v24  ;;  %785 = vmatpush1.bf16.msra.mxu1 %v1695_v25 }
  0x2b   : > { %648 = vmatprep.subr.bf16.mxu0 %v1700_v26  ;;  %786 = vmatprep.subr.bf16.mxu1 %v1703_v27 }
  0x2e   : > { %649 = vmatpush1.bf16.msra.mxu0 %v1698_v28  ;;  %787 = vmatpush1.bf16.msra.mxu1 %v1701_v29  ;;  %v1716_v29 = vld [vmem:[%s2238_s7] sm:$0xff]  }
  0x2f   : > { %650 = vmatprep.subr.bf16.mxu0 %v1706_v30  ;;  %788 = vmatprep.subr.bf16.mxu1 %v1709_v31  ;;  %v1717_v30 = vld [vmem:[%s2238_s7 + $0x40] sm:$0xff]  }
  0x32   : > { %651 = vmatpush1.bf16.msra.mxu0 %v1704_v32  ;;  %789 = vmatpush1.bf16.msra.mxu1 %v1707_v33  ;;  %v1718_v32 = vld [vmem:[%s2238_s7 + $0x8] sm:$0xff]  }
  0x33   : > { %652 = vmatprep.subr.bf16.mxu0 %v1712_v34  ;;  %790 = vmatprep.subr.bf16.mxu1 %v1715_v35  ;;  %v1719_v33 = vld [vmem:[%s2238_s7 + $0x48] sm:$0xff]   ;;  %v1720_v34 = vld [vmem:[%s2238_s7 + $0x10] sm:$0xff]  }
  0x34   : > { %v1721_v35 = vld [vmem:[%s2238_s7 + $0x50] sm:$0xff]  }
  0x36   : > { %653 = vmatpush1.bf16.msra.mxu0 %v1710_v36  ;;  %791 = vmatpush1.bf16.msra.mxu1 %v1713_v37  ;;  %v1722_v36 = vld [vmem:[%s2238_s7 + $0x18] sm:$0xff]  }
  0x37   : > { %1559 = vmatprep.subr.bf16.mxu1 %v1813_v38  ;;  %1539 = vmatprep.subr.bf16.mxu0 %v1813_v38  ;;  %v1723_v37 = vld [vmem:[%s2238_s7 + $0x58] sm:$0xff]  }
  0xec   : > { %v390_v39 = vpop.f32.mrb[0].mxu0  ;;  %v446_v40 = vpop.f32.mrb[0].mxu1 }
  0xed   : > { %v460_v41 = vrot.slane %v390_v39, 7  ;;  %v392_v42 = vpop.f32.mrb[1].mxu0  ;;  %v448_v43 = vpop.f32.mrb[1].mxu1  ;;  %v1724_v39 = vld [vmem:[%s2238_s7 + $0x20] sm:$0xff]  }
  0xee   : > { %v461_v44 = vrot.slane %v392_v42, 7  ;;  %v394_v45 = vpop.f32.mrb[2].mxu0  ;;  %v450_v46 = vpop.f32.mrb[2].mxu1  ;;  %v1727_v42 = vld [vmem:[%s2238_s7 + $0x68] sm:$0xff]  }
  0xef   : > { %v470_v47 = vsel %vm459_vm1, 0.0, %v460_v41  ;;  %v462_v49 = vrot.slane %v394_v45, 7  ;;  %v396_v50 = vpop.f32.mrb[3].mxu0  ;;  %v452_v51 = vpop.f32.mrb[3].mxu1  ;;  %v1730_v45 = vld [vmem:[%s2238_s7 + $0x38] sm:$0xff]  }
  0xf0   : > { %v472_v52 = vadd.f32 %v470_v47, %v446_v40  ;;  %v471_v53 = vsel %vm459_vm1, 0.0, %v461_v44  ;;  %v464_v54 = vrot.slane %v396_v50, 7  ;;  %v1725_v40 = vld [vmem:[%s2238_s7 + $0x60] sm:$0xff]  }
  0xf1   : > { %v473_v56 = vadd.f32 %v471_v53, %v448_v43  ;;  %v463_v57 = vsel %vm459_vm1, %v460_v41, %v462_v49  ;;  %v1726_v41 = vld [vmem:[%s2238_s7 + $0x28] sm:$0xff]   ;;  %v1728_v43 = vld [vmem:[%s2238_s7 + $0x30] sm:$0xff]  }
  0xf2   : > { %v484_v58 = vmul.f32 %v1368_v48, %v472_v52  ;;  %v474_v59 = vadd.f32 %v463_v57, %v450_v46  ;;  %v465_v60 = vsel %vm459_vm1, %v461_v44, %v464_v54  ;;  %v1729_v44 = vld [vmem:[%s2238_s7 + $0x70] sm:$0xff]   ;;  %v1731_v46 = vld [vmem:[%s2238_s7 + $0x78] sm:$0xff]  }
  0xf3   : > { %v496_v61 = vmul.f32 %v1368_v48, %v473_v56  ;;  %v475_v62 = vadd.f32 %v465_v60, %v452_v51  ;;  %v1418_v56 = vld [vmem:[%s2236_s5] ss:$0 sm:$0xff] }
  0xf4   : > { %v492_v63 = vadd.f32 %v1369_v55, %v484_v58  ;;  %v485_v0 = vmul.f32 %v1368_v48, %v474_v59 }
  0xf5   : > { %v498_v1 = vadd.f32 %v1369_v55, %v496_v61  ;;  %v497_v2 = vmul.f32 %v1368_v48, %v475_v62  ;;  %v1419_v61 = vld [vmem:[%s2237_s6] ss:$0 sm:$0xff] }
  0xf6   : > { %v494_v3 = vmax.f32 %v492_v63, 0.0  ;;  %v493_v4 = vadd.f32 %v1369_v55, %v485_v0 }
  0xf7   : > { %v500_v5 = vmax.f32 %v498_v1, 0.0  ;;  %v499_v6 = vadd.f32 %v1369_v55, %v497_v2 }
  0xf8   : > { %v495_v7 = vmax.f32 %v493_v4, 0.0 }
  0xf9   : > { %v502_v8 = vmax.f32 %v494_v3, %v500_v5  ;;  %v501_v9 = vmax.f32 %v499_v6, 0.0 }
  0xfb   : > { %v505_v10 = vrot.slane %v502_v8, 1  ;;  %v503_v11 = vmax.f32 %v495_v7, %v501_v9 }
  0xfd   : > { %v507_v12 = vmax.f32 %v502_v8, %v505_v10  ;;  %v509_v13 = vrot.slane %v503_v11, 1  ;;  %v1732_v8 = vld [vmem:[%s2238_s7 + $0xc0] sm:$0xff]  }
  0xfe   : > { %v1733_v10 = vld [vmem:[%s2238_s7 + $0x80] sm:$0xff]  }
  0xff   : > { %v513_v14 = vrot.slane %v507_v12, 1  ;;  %v515_v15 = vrot.slane %v507_v12, 2  ;;  %v511_v16 = vmax.f32 %v503_v11, %v509_v13  ;;  %v517_v17 = vrot.slane %v507_v12, 3  ;;  %v1735_v13 = vld [vmem:[%s2238_s7 + $0x88] sm:$0xff]  }
 0x101   : > { %v528_v18 = vsel %vm459_vm1, %v507_v12, %v513_v14  ;;  %v520_v19 = vrot.slane %v511_v16, 4  ;;  %v522_v21 = vrot.slane %v511_v16, 5  ;;  %v524_v23 = vrot.slane %v511_v16, 6  ;;  %v1734_v12 = vld [vmem:[%s2238_s7 + $0xc8] sm:$0xff]   ;;  %v1736_v14 = vld [vmem:[%s2238_s7 + $0xd0] sm:$0xff]  }
 0x102   : > { %v530_v20 = vsel %vm529_vm2, %v528_v18, %v515_v15  ;;  %v526_v25 = vrot.slane %v511_v16, 7  ;;  %v1737_v15 = vld [vmem:[%s2238_s7 + $0x90] sm:$0xff]   ;;  %v1738_v16 = vld [vmem:[%s2238_s7 + $0xd8] sm:$0xff]   ;;  %v1740_v18 = vld [vmem:[%s2238_s7 + $0xe0] sm:$0xff]  }
 0x103   : > { %v532_v22 = vsel %vm531_vm3, %v530_v20, %v517_v17  ;;  %v1739_v17 = vld [vmem:[%s2238_s7 + $0x98] sm:$0xff]   ;;  %v1742_v20 = vld [vmem:[%s2238_s7 + $0xe8] sm:$0xff]  }
 0x104   : > { %v534_v24 = vsel %vm533_vm4, %v532_v22, %v520_v19  ;;  %v1741_v19 = vld [vmem:[%s2238_s7 + $0xa0] sm:$0xff]   ;;  %v1744_v22 = vld [vmem:[%s2238_s7 + $0xf0] sm:$0xff]  }
 0x105   : > { %v536_v26 = vsel %vm535_vm5, %v534_v24, %v522_v21  ;;  %v1743_v21 = vld [vmem:[%s2238_s7 + $0xa8] sm:$0xff]   ;;  %v1746_v24 = vld [vmem:[%s2238_s7 + $0xf8] sm:$0xff]  }
 0x106   : > { %v538_v27 = vsel %vm537_vm6, %v536_v26, %v524_v23  ;;  %v1745_v23 = vld [vmem:[%s2238_s7 + $0xb0] sm:$0xff]  }
 0x107   : > { %v540_v28 = vsel %vm539_vm7, %v538_v27, %v526_v25  ;;  %v1747_v25 = vld [vmem:[%s2238_s7 + $0xb8] sm:$0xff]  }
 0x108   : > { %v541_v31 = vpack.c.bf16 %v540_v28, %v540_v28 }
 0x10a   : > { %671 = vmatmul.mubr.bf16.vlgmr.msra.gmra.mrb[4].mxu0 %v541_v31  ;;  %809 = vmatmul.mubr.bf16.vlgmr.msra.gmra.mrb[4].mxu1 %v541_v31 }
 0x10b   : > { %1560 = vmatpush3.bf16.msra.mxu1 %v1716_v29  ;;  %1540 = vmatpush3.bf16.msra.mxu0 %v1717_v30 }
 0x10c   : > { %1561 = vmatprep.subr.bf16.mxu1 %v1813_v38  ;;  %1541 = vmatprep.subr.bf16.mxu0 %v1813_v38 }
 0x10d   : > { %1575 = vmatprep.mubr.msk.bf16.mxu1 %vm1814_vm8, %v1813_v38  ;;  %1555 = vmatprep.mubr.msk.bf16.mxu0 %vm1814_vm8, %v1813_v38 }
 0x10f   : > { %1562 = vmatpush3.bf16.msra.mxu1 %v1718_v32  ;;  %1542 = vmatpush3.bf16.msra.mxu0 %v1719_v33 }
 0x110   : > { %1563 = vmatprep.subr.bf16.mxu1 %v1813_v38  ;;  %1543 = vmatprep.subr.bf16.mxu0 %v1813_v38 }
 0x113   : > { %1564 = vmatpush3.bf16.msra.mxu1 %v1720_v34  ;;  %1544 = vmatpush3.bf16.msra.mxu0 %v1721_v35 }
 0x114   : > { %1565 = vmatprep.subr.bf16.mxu1 %v1813_v38  ;;  %1545 = vmatprep.subr.bf16.mxu0 %v1813_v38 }
 0x117   : > { %1566 = vmatpush3.bf16.msra.mxu1 %v1722_v36  ;;  %1546 = vmatpush3.bf16.msra.mxu0 %v1723_v37 }
 0x118   : > { %1567 = vmatprep.subr.bf16.mxu1 %v1813_v38  ;;  %1547 = vmatprep.subr.bf16.mxu0 %v1813_v38 }
 0x11b   : > { %1568 = vmatpush3.bf16.msra.mxu1 %v1724_v39  ;;  %1548 = vmatpush3.bf16.msra.mxu0 %v1725_v40 }
 0x11c   : > { %1569 = vmatprep.subr.bf16.mxu1 %v1813_v38  ;;  %1549 = vmatprep.subr.bf16.mxu0 %v1813_v38 }
 0x11f   : > { %1570 = vmatpush3.bf16.msra.mxu1 %v1726_v41  ;;  %1550 = vmatpush3.bf16.msra.mxu0 %v1727_v42 }
 0x120   : > { %1571 = vmatprep.subr.bf16.mxu1 %v1813_v38  ;;  %1551 = vmatprep.subr.bf16.mxu0 %v1813_v38 }
 0x123   : > { %1572 = vmatpush3.bf16.msra.mxu1 %v1728_v43  ;;  %1552 = vmatpush3.bf16.msra.mxu0 %v1729_v44  ;;  %v1281_v44 = vld [vmem:[%s2239_s8] sm:$0x1] }
 0x124   : > { %1573 = vmatprep.subr.bf16.mxu1 %v1813_v38  ;;  %1553 = vmatprep.subr.bf16.mxu0 %v1813_v38 }
 0x127   : > { %1574 = vmatpush3.bf16.msra.mxu1 %v1730_v45  ;;  %1554 = vmatpush3.bf16.msra.mxu0 %v1731_v46 }
 0x128   : > { %1599 = vmatprep.subr.bf16.mxu1 %v1813_v38  ;;  %1579 = vmatprep.subr.bf16.mxu0 %v1813_v38 }
 0x1dd   : > { %v672_v47 = vpop.f32.mrb[4].mxu0  ;;  %v810_v48 = vpop.f32.mrb[4].mxu1 }
 0x1de   : > { %v819_v49 = vrot.slane %v672_v47, 7  ;;  %v674_v50 = vpop.f32.mrb[5].mxu0  ;;  %v812_v51 = vpop.f32.mrb[5].mxu1 }
 0x1df   : > { %v820_v52 = vrot.slane %v674_v50, 7  ;;  %v676_v53 = vpop.f32.mrb[6].mxu0  ;;  %v814_v54 = vpop.f32.mrb[6].mxu1 }
 0x1e0   : > { %v823_v55 = vsel %vm459_vm1, 0.0, %v819_v49  ;;  %v677_v57 = vpop.f32.mrb[7].mxu0  ;;  %v815_v58 = vpop.f32.mrb[7].mxu1 }
 0x1e1   : > { %v825_v59 = vadd.f32 %v823_v55, %v810_v48  ;;  %v824_v60 = vsel %vm459_vm1, 0.0, %v820_v52 }
 0x1e2   : > { %v826_v62 = vadd.f32 %v824_v60, %v812_v51 }
 0x1e3   : > { %v835_v63 = vmul.f32 %v1418_v56, %v825_v59 }
 0x1e4   : > { %v844_v0 = vmul.f32 %v1418_v56, %v826_v62 }
 0x1e5   : > { %v842_v1 = vadd.f32 %v1419_v61, %v835_v63 }
 0x1e6   : > { %v845_v2 = vadd.f32 %v1419_v61, %v844_v0 }
 0x1e7   : > { %v843_v3 = vmax.f32 %v842_v1, 0.0 }
 0x1e8   : > { %v846_v4 = vmax.f32 %v845_v2, 0.0 }
 0x1ea   : > { %v847_v5 = vmax.f32 %v843_v3, %v846_v4 }
 0x1ec   : > { %v849_v6 = vrot.slane %v847_v5, 1 }
 0x1ee   : > { %v851_v7 = vmax.f32 %v847_v5, %v849_v6 }
 0x1f0   : > { %v852_v9 = vpack.c.bf16 %v851_v7, %v851_v7 }
 0x1f2   : > { %1576 = vmatmul.mubr.bf16.vlgmr.msra.gmra.mrb[8].mxu1 %v852_v9  ;;  %v887_v11 = vrot.slane %v852_v9, 1  ;;  %v1190_v26 = vrot.slane %v852_v9, 3  ;;  %v1082_v27 = vrot.slane %v852_v9, 2 }
 0x1f3   : > { %1600 = vmatpush3.bf16.msra.mxu1 %v1732_v8  ;;  %1615 = vmatprep.mubr.msk.bf16.mxu1 %vm1814_vm8, %v1813_v38 }
 0x1f4   : > { %1556 = vmatmul.mubr.bf16.vlgmr.msra.gmra.mrb[8].mxu0 %v887_v11  ;;  %1601 = vmatprep.subr.bf16.mxu1 %v1813_v38 }
 0x1f5   : > { %1580 = vmatpush3.bf16.msra.mxu0 %v1733_v10  ;;  %1595 = vmatprep.mubr.msk.bf16.mxu0 %vm1814_vm8, %v1813_v38 }
 0x1f6   : > { %1581 = vmatprep.subr.bf16.mxu0 %v1813_v38 }
 0x1f7   : > { %1602 = vmatpush3.bf16.msra.mxu1 %v1734_v12 }
 0x1f8   : > { %1603 = vmatprep.subr.bf16.mxu1 %v1813_v38 }
 0x1f9   : > { %1582 = vmatpush3.bf16.msra.mxu0 %v1735_v13 }
 0x1fa   : > { %1583 = vmatprep.subr.bf16.mxu0 %v1813_v38 }
 0x1fb   : > { %1604 = vmatpush3.bf16.msra.mxu1 %v1736_v14 }
 0x1fc   : > { %1605 = vmatprep.subr.bf16.mxu1 %v1813_v38 }
 0x1fd   : > { %1584 = vmatpush3.bf16.msra.mxu0 %v1737_v15 }
 0x1fe   : > { %1585 = vmatprep.subr.bf16.mxu0 %v1813_v38 }
 0x1ff   : > { %1606 = vmatpush3.bf16.msra.mxu1 %v1738_v16 }
 0x200   : > { %1607 = vmatprep.subr.bf16.mxu1 %v1813_v38 }
 0x201   : > { %1586 = vmatpush3.bf16.msra.mxu0 %v1739_v17 }
 0x202   : > { %1587 = vmatprep.subr.bf16.mxu0 %v1813_v38 }
 0x203   : > { %1608 = vmatpush3.bf16.msra.mxu1 %v1740_v18 }
 0x204   : > { %1609 = vmatprep.subr.bf16.mxu1 %v1813_v38 }
 0x205   : > { %1588 = vmatpush3.bf16.msra.mxu0 %v1741_v19 }
 0x206   : > { %1589 = vmatprep.subr.bf16.mxu0 %v1813_v38 }
 0x207   : > { %1610 = vmatpush3.bf16.msra.mxu1 %v1742_v20 }
 0x208   : > { %1611 = vmatprep.subr.bf16.mxu1 %v1813_v38 }
 0x209   : > { %1590 = vmatpush3.bf16.msra.mxu0 %v1743_v21 }
 0x20a   : > { %1591 = vmatprep.subr.bf16.mxu0 %v1813_v38 }
 0x20b   : > { %1612 = vmatpush3.bf16.msra.mxu1 %v1744_v22 }
 0x20c   : > { %1613 = vmatprep.subr.bf16.mxu1 %v1813_v38 }
 0x20d   : > { %1592 = vmatpush3.bf16.msra.mxu0 %v1745_v23 }
 0x20e   : > { %1593 = vmatprep.subr.bf16.mxu0 %v1813_v38 }
 0x20f   : > { %1614 = vmatpush3.bf16.msra.mxu1 %v1746_v24 }
 0x211   : > { %1594 = vmatpush3.bf16.msra.mxu0 %v1747_v25 }
 0x212   : > { %1616 = vmatmul.mubr.bf16.vlgmr.msra.gmra.mrb[12].mxu1 %v1190_v26 }
 0x214   : > { %1596 = vmatmul.mubr.bf16.vlgmr.msra.gmra.mrb[12].mxu0 %v1082_v27 }
 0x2c5   : > { %v1059_v28 = vpop.f32.mrb[8].mxu1 }
 0x2c6   : > { %v1577_v29 = vpop.f32.mrb[9].mxu1 }
 0x2c7   : > { %v971_v30 = vpop.f32.mrb[8].mxu0  ;;  %v1062_v31 = vpop.f32.mrb[10].mxu1 }
 0x2c8   : > { %v1060_v32 = vadd.f32 %v1059_v28, %v971_v30  ;;  %v1557_v33 = vpop.f32.mrb[9].mxu0  ;;  %v1578_v34 = vpop.f32.mrb[11].mxu1 }
 0x2c9   : > { %v974_v35 = vpop.f32.mrb[10].mxu0 }
 0x2ca   : > { %v1558_v36 = vpop.f32.mrb[11].mxu0 }
 0x2e5   : > { %v1274_v37 = vpop.f32.mrb[12].mxu1 }
 0x2e6   : > { %v1617_v38 = vpop.f32.mrb[13].mxu1 }
 0x2e7   : > { %v1166_v39 = vpop.f32.mrb[12].mxu0  ;;  %v1277_v40 = vpop.f32.mrb[14].mxu1 }
 0x2e8   : > { %v1172_v41 = vadd.f32 %v1166_v39, %v1060_v32  ;;  %v1597_v42 = vpop.f32.mrb[13].mxu0  ;;  %v1618_v43 = vpop.f32.mrb[15].mxu1 }
 0x2e9   : > { %v1169_v45 = vpop.f32.mrb[14].mxu0 }
 0x2ea   : > { %v1280_v46 = vadd.f32 %v1274_v37, %v1172_v41  ;;  %v1598_v47 = vpop.f32.mrb[15].mxu0 }
 0x2ec   : > { %v1282_v48 = vadd.f32 %v1281_v44, %v1280_v46 }
 0x2ee   : > { %1284 = vst.msk [vmem:[%s325_s16] sm:$0x1] %vm1283_vm9, %v1282_v48 }
 0x2ef   : > { %1761 = shalt.err (!%p1758_p3)
}
 0x2f0   : > { %s1762_s27 = scalar_lea.hbm %s2189_s22, 16  ;;  %s1766_s16 = scalar_lea.hbm %s2240_s9, 32 }
 0x2f1   : > { %p1763_p4 = scmp.ne.s32.totalorder %s2189_s22, %s1762_s27  ;;  %p1767_p9 = scmp.lt.u32.totalorder %s2189_s22, %s2240_s9 }
 0x2f2   : > { %p1768_p10 = scmp.lt.u32.totalorder %s1766_s16, %s1762_s27  ;;  %p1770_p12 = scmp.lt.u32.totalorder %s1762_s27, %s2189_s22 }
 0x2f3   : > { %p1764_p7 = pnand %p1763_p4, %p1904_p5 }
 0x2f4   : > { %p1769_p11 = por %p1768_p10, %p1767_p9 }
 0x2f5   : > { %p1765_p8 = pneg %p1764_p7 }
 0x2f6   : > { %p1771_p13 = por %p1770_p12, %p1769_p11 }
 0x2f8   : > { %p1772_p0 = pnand %p1771_p13, %p1765_p8 }
 0x2fa   : > { %1775 = shalt.err (!%p1772_p0)
}
 0x2fb   : > { %1619 = dma.vmem_to_hbm [thread:$0]  (%p1904_p5), %s2191_s23, 16, %s2189_s22, %s1286_s24  }
 0x2fc PF: > { %p1625_p1 = scmp.ge.s32.totalorder %s1810_s12, 2  ;;  %s1310_s25 = sand.u32 1, %s1798_s30  }
 0x2fd   : > { %s1311_s13 = scalar_lea.sflag [#allocation3], %s1310_s25 }
 0x2fe   : > { %p1622_p2 = pnand %p1625_p1, %p1908_p6 }
 0x300   : > { %1793 = dma.done.wait (!%p1622_p2), %s1311_s13, 16  }
 0x301   : > { %1795 = vsyncadd (!%p1622_p2), %s1311_s13, 4294967280  ;;  %p19_p3 = scmp.ge.s32.totalorder %s1891_s15, 4   ;;  %s2243_s30 = smov %s1802_s10 }
 0x302   : > { %s2244_s10 = smov %s1806_s11  ;;  %s2245_s11 = smov %s1902_s18 }
 0x303   : > { %s2246_s12 = smov %s1891_s15  ;;  %21 = sbr.rel (!%p19_p3) target bundleno = 3 (0x3), region = 96 }
 0x30a   :  { %1315 = vsyncpa [#allocation3], 1 }
 0x30b   :  { %1317 = vsyncpa [#allocation3 + $0x1], 1 }

</bundles_post_ra>
